<compile_context>
chip_gen: v5e
topology: v5e:2x2
jax: 0.10.0
libtpu: 0.0.40
codegen_flags: <defaults>
</compile_context>

<pallas_src>
import functools
import math

import jax
import jax.numpy as jnp
import numpy as np
from jax.experimental import pallas as pl
from jax.experimental.pallas import tpu as pltpu


def _build_pe_table(d_model: int, max_len: int) -> jnp.ndarray:
    """Deterministic positional-encoding buffer, identical to the PyTorch __init__."""
    position = np.arange(max_len, dtype=np.float32)[:, None]               # [max_len, 1]
    div_term = np.exp(np.arange(0, d_model, 2, dtype=np.float32)
                      * (-math.log(10000.0) / d_model))                    # [d_model//2]
    pe = np.zeros((max_len, 1, d_model), dtype=np.float32)
    pe[:, 0, 0::2] = np.sin(position * div_term)
    pe[:, 0, 1::2] = np.cos(position * div_term)
    return jnp.asarray(pe)


def _pe_add_kernel(x_ref, pe_ref, o_ref, *, batch: int):
    # x_ref: (TS, B*D)   pe_ref: (TS, D)   o_ref: (TS, B*D)
    pe_tiled = jnp.tile(pe_ref[...], (1, batch))          # broadcast over batch on-chip
    o_ref[...] = (x_ref[...] + pe_tiled).astype(o_ref.dtype)


def _pe_add_dropout_kernel(x_ref, pe_ref, m_ref, o_ref, *, batch: int):
    # m_ref: (TS, B*D) scaled keep-mask (0 or 1/keep_prob)
    pe_tiled = jnp.tile(pe_ref[...], (1, batch))
    y = (x_ref[...] + pe_tiled) * m_ref[...]
    o_ref[...] = y.astype(o_ref.dtype)


def _choose_seq_tile(S: int, B: int, D: int, itemsize: int,
                     vmem_budget_bytes: int = 12 * 1024 * 1024) -> int:
    """Pick a sequence tile TS so the double-buffered working set stays small.

    Working set per grid step (worst case, train mode):
      2 buffers * (x block + mask block + out block + pe block)
      = 2 * ((3*B + 1) * D * itemsize) * TS  bytes
    12 MiB total keeps us inside the default scoped VMEM on v5e/v6e/v7x while
    still giving multi-MiB blocks (the measured HBM-roofline sweet spot).
    """
    row_bytes = (3 * B + 1) * D * itemsize
    max_rows = max(1, vmem_budget_bytes // (2 * row_bytes))
    if S <= max_rows:
        return S                       # whole tensor in one block, grid=(1,)
    ts = max(8, (min(S, max_rows) // 8) * 8)   # keep sublane tiling (multiple of 8)
    # Prefer a tile that divides S so there is no ragged tail block.
    t = ts
    while t >= 8:
        if S % t == 0:
            return t
        t -= 8
    return ts                          # ragged tail: Pallas masks the boundary block


def positional_encoding(x: jnp.ndarray,
                        pe: jnp.ndarray,
                        *,
                        dropout_p: float = 0.1,
                        train: bool = False,
                        rng_key=None) -> jnp.ndarray:
    """x: [S, B, D]; pe: [max_len, 1, D] float32 with max_len >= S."""
    S, B, D = x.shape
    keep_prob = 1.0 - float(dropout_p)

    # Lane-dense 2-D views (free, row-major reshapes).
    x2 = x.reshape(S, B * D)
    pe2 = pe[:S, 0, :].astype(jnp.float32)            # [S, D]

    ts = _choose_seq_tile(S, B, D, jnp.dtype(x.dtype).itemsize)
    grid = (pl.cdiv(S, ts),)

    in_specs = [
        pl.BlockSpec((ts, B * D), lambda i: (i, 0)),   # x slab
        pl.BlockSpec((ts, D), lambda i: (i, 0)),       # pe slab (no batch broadcast in HBM)
    ]
    inputs = [x2, pe2]

    use_dropout = train and keep_prob < 1.0
    if use_dropout:
        if rng_key is None:
            rng_key = jax.random.PRNGKey(0)
        keep = jax.random.bernoulli(rng_key, keep_prob, (S, B * D))
        mask = keep.astype(x.dtype) * jnp.asarray(1.0 / keep_prob, dtype=x.dtype)
        in_specs.append(pl.BlockSpec((ts, B * D), lambda i: (i, 0)))
        inputs.append(mask)
        kernel = functools.partial(_pe_add_dropout_kernel, batch=B)
    else:
        kernel = functools.partial(_pe_add_kernel, batch=B)

    out2 = pl.pallas_call(
        kernel,
        out_shape=jax.ShapeDtypeStruct((S, B * D), x.dtype),
        grid=grid,
        in_specs=in_specs,
        out_specs=pl.BlockSpec((ts, B * D), lambda i: (i, 0)),
        compiler_params=pltpu.CompilerParams(
            dimension_semantics=("parallel",),         # shard S-tiles across v7x's 2 TCs
        ),
    )(*inputs)
    return out2.reshape(S, B, D)


if __name__ == "__main__":
    S, B, D = 8, 2, 32          # seq_len, batch, d_model
    MAX_LEN = 64

    key = jax.random.PRNGKey(0)
    kx, kmask = jax.random.split(key)
    x = jax.random.normal(kx, (S, B, D), dtype=jnp.float32)
    pe = _build_pe_table(D, MAX_LEN)

    # Eval-mode (dropout = identity): must match the pure-JAX reference exactly.
    out_eval = positional_encoding(x, pe, dropout_p=0.1, train=False)
    out_eval = jax.block_until_ready(out_eval)
    ref_eval = x + pe[:S]
    np.testing.assert_allclose(np.asarray(out_eval), np.asarray(ref_eval),
                               rtol=1e-6, atol=1e-6)

    # Train-mode: dropout mask drawn in the wrapper (same key -> reproducible reference).
    dropout_p = 0.1
    out_train = positional_encoding(x, pe, dropout_p=dropout_p, train=True, rng_key=kmask)
    out_train = jax.block_until_ready(out_train)
    keep = jax.random.bernoulli(kmask, 1.0 - dropout_p, (S, B * D)).reshape(S, B, D)
    ref_train = (x + pe[:S]) * keep.astype(jnp.float32) / (1.0 - dropout_p)
    np.testing.assert_allclose(np.asarray(out_train), np.asarray(ref_train),
                               rtol=1e-6, atol=1e-6)
    assert out_train.shape == (S, B, D)

    print("KERNEL_OK")
</pallas_src>

<mosaic_0001>
module attributes {stable_mosaic.version = 11 : i64} {
  func.func @_pe_add_kernel(%arg0: i32, %arg1: memref<8x64xf32, #tpu.memory_space<vmem>>, %arg2: memref<8x32xf32, #tpu.memory_space<vmem>>, %arg3: memref<8x64xf32, #tpu.memory_space<vmem>>) attributes {dimension_semantics = [#tpu.dimension_semantics<parallel>], iteration_bounds = array<i64: 1>, scalar_prefetch = 0 : i64, scratch_operands = 0 : i64, tpu.core_type = #tpu.core_type<tc>, window_params = [{transform_indices = @transform_0, window_bounds = array<i64: 8, 64>}, {transform_indices = @transform_1, window_bounds = array<i64: 8, 32>}, {transform_indices = @transform_2, window_bounds = array<i64: 8, 64>}]} {
    %c0 = arith.constant 0 : index
    %c0_0 = arith.constant 0 : index
    %0 = vector.load %arg2[%c0, %c0_0] : memref<8x32xf32, #tpu.memory_space<vmem>>, vector<8x32xf32>
    %1 = tpu.concatenate %0, %0 in 1 : vector<8x32xf32>, vector<8x32xf32> -> vector<8x64xf32>
    %c0_1 = arith.constant 0 : index
    %c0_2 = arith.constant 0 : index
    %2 = vector.load %arg1[%c0_1, %c0_2] : memref<8x64xf32, #tpu.memory_space<vmem>>, vector<8x64xf32>
    %3 = arith.addf %2, %1 : vector<8x64xf32>
    %c0_3 = arith.constant 0 : index
    %c0_4 = arith.constant 0 : index
    %4 = vector.load %arg3[%c0_3, %c0_4] : memref<8x64xf32, #tpu.memory_space<vmem>>, vector<8x64xf32>
    tpu.vector_store %arg3[%c0_3, %c0_4], %3 {strides = array<i32>} : memref<8x64xf32, #tpu.memory_space<vmem>>, vector<8x64xf32>,
    return
  }
  func.func @transform_0(%arg0: i32) -> (i32, i32) {
    %c0_i32 = arith.constant 0 : i32
    %c0_i32_0 = arith.constant 0 : i32
    return %arg0, %c0_i32 : i32, i32
  }
  func.func @transform_1(%arg0: i32) -> (i32, i32) {
    %c0_i32 = arith.constant 0 : i32
    %c0_i32_0 = arith.constant 0 : i32
    return %arg0, %c0_i32 : i32, i32
  }
  func.func @transform_2(%arg0: i32) -> (i32, i32) {
    %c0_i32 = arith.constant 0 : i32
    %c0_i32_0 = arith.constant 0 : i32
    return %arg0, %c0_i32 : i32, i32
  }
}

</mosaic_0001>

<bundles_post_ra>
// kernel: tpu_custom_call.1
= control target key start
LH: loop header
LB: loop body
LE: loop exit
PB: predicated region body
PF: predicated region fallthrough
CT: control target
= control target key end

     0   :  { %7 = vsyncpa [#allocation3], 0  ;;  %s179_s0 = inlined_call_operand.hbm [shape: f32[8,64], index: 0, kind: input, shape index: {}]   ;;  %s180_s1 = inlined_call_operand.hbm [shape: f32[8,32], index: 1, kind: input, shape index: {}]   ;;  %s181_s2 = inlined_call_operand.hbm [shape: f32[8,64], index: 2, kind: output, shape index: {}]  }
   0x1   :  { %8 = vsyncpa [#allocation6], 0 }
   0x2   :  { %9 = vsyncpa [#allocation4], 0  ;;  %s15_s11 = sshll.u32 %s179_s0, 4  ;;  %s151_s12 = smov [#allocation2]   ;;  %s16_s11 = int_to_ptr.hbm [resolvable:$true] %s15_s11 }
   0x3   :  { %s17_s13 = sshll.u32 %s151_s12, 4  ;;  %s26_s16 = sshll.u32 %s180_s1, 4  ;;  %s18_s13 = int_to_ptr.vmem [resolvable:$true] %s17_s13  ;;  %s27_s16 = int_to_ptr.hbm [resolvable:$true] %s26_s16 }
   0x4   :  { %20 = dma.hbm_to_vmem [thread:$0]  %s16_s11, 128, %s18_s13, [#allocation3]  }
   0x5   :  { %s152_s17 = smov [#allocation5]  }
   0x6   :  { %s28_s18 = sshll.u32 %s152_s17, 4  ;;  %s29_s18 = int_to_ptr.vmem [resolvable:$true] %s28_s18 }
   0x7   :  { %31 = dma.hbm_to_vmem [thread:$0]  %s27_s16, 128, %s29_s18, [#allocation6]  }
   0x8   :  { %145 = dma.done.wait [#allocation3], 128  }
   0x9   :  { %146 = vsyncadd [#allocation3], 4294967168 }
   0xa   :  { %147 = dma.done.wait [#allocation6], 128  }
   0xb   :  { %148 = vsyncadd [#allocation6], 4294967168  ;;  %v40_v0 = vld [vmem:[#allocation5] sm:$0xff]  ;;  %s153_s0 = smov 32   ;;  %vm45_vm0 = vcmask 261120   ;;  %v47_v1 = vld [vmem:[#allocation2] sm:$0xff] }
   0xc   :  { %42 = vrot.lane.b32.xlu0 %v40_v0, %s153_s0  ;;  %s154_s19 = smov [#allocation7]   ;;  %s58_s1 = sshll.u32 %s181_s2, 4  ;;  %vm49_vm1 = vcmask 523264   ;;  %s59_s1 = int_to_ptr.hbm [resolvable:$true] %s58_s1 }
   0xd   :  { %s56_s20 = sshll.u32 %s154_s19, 4  ;;  %s57_s20 = int_to_ptr.vmem [resolvable:$true] %s56_s20 }
  0x7e   :  { %v43_v2 = vpop.permute.xlu0 %42 }
  0x7f   :  { %v46_v3 = vsel %vm45_vm0, %v40_v0, %v43_v2 }
  0x80   :  { %v48_v4 = vadd.f32 %v47_v1, %v46_v3 }
  0x82   :  { %50 = vst.msk [vmem:[#allocation7] sm:$0xff] %vm49_vm1, %v48_v4 }
  0x83   :  { %61 = dma.vmem_to_hbm [thread:$0]  %s57_s20, 128, %s59_s1, [#allocation4]  }
  0x84   :  { %149 = dma.done.wait [#allocation4], 128  }
  0x85   :  { %150 = vsyncadd [#allocation4], 4294967168 }
  0x86   :  { %66 = vsyncpa [#allocation3], 1 }
  0x87   :  { %67 = vsyncpa [#allocation6], 1 }
  0x88   :  { %68 = vsyncpa [#allocation4], 1 }

</bundles_post_ra>
